<compile_context>
chip_gen: v7x
topology: tpu7x:2x2x1
jax: 0.10.0
libtpu: 0.0.40
codegen_flags: <defaults>
</compile_context>

<pallas_src>
import functools

import jax
import jax.numpy as jnp
from jax.experimental import pallas as pl
from jax.experimental.pallas import tpu as pltpu


def _rmsnorm_kernel(*refs, eps, inv_sqrt_dx, partial_size, has_offset):
    if has_offset:
        x_ref, scale_ref, offset_ref, out_ref = refs
    else:
        x_ref, scale_ref, out_ref = refs

    x = x_ref[...].astype(jnp.float32)                       # (bm, d)

    if partial_size is None:
        sq = x * x
    else:
        # partial RMSNorm: only the first `partial_size` features enter the norm
        col = jax.lax.broadcasted_iota(jnp.int32, x.shape, 1)
        sq = jnp.where(col < partial_size, x * x, 0.0)

    ssum = jnp.sum(sq, axis=-1, keepdims=True)                # (bm, 1) XLU reduce
    rms = jnp.sqrt(ssum) * inv_sqrt_dx                        # norm * d_x^{-1/2}
    inv = pl.reciprocal(rms + eps, approx=False)              # exact 1/(rms+eps), EUP

    out = x * inv * scale_ref[...].astype(jnp.float32)
    if has_offset:
        out = out + offset_ref[...].astype(jnp.float32)
    out_ref[...] = out.astype(out_ref.dtype)


def rmsnorm(x, scale, offset=None, *, p=-1.0, eps=1e-8, max_block_rows=1024):
    """RMSNorm over the last dim of x, matching the PyTorch module semantics."""
    orig_shape = x.shape
    d = orig_shape[-1]

    if 0.0 <= p <= 1.0:
        partial_size = int(d * p)
        d_x = partial_size
        if partial_size == d:          # full norm -> skip the mask entirely
            partial_size = None
    else:
        partial_size = None
        d_x = d

    x2 = x.reshape(-1, d)              # metadata-only for contiguous arrays
    M = x2.shape[0]

    # Row tile: multiple of 8, sized so the double-buffered x/out tiles stay
    # comfortably inside the default scoped-VMEM window, capped by row count.
    itemsize = jnp.dtype(x.dtype).itemsize
    budget = 2 * 1024 * 1024           # ~2 MiB per x tile
    bm = max(8, min(max_block_rows, (budget // max(1, d * itemsize)) // 8 * 8))
    bm = min(bm, ((M + 7) // 8) * 8)   # don't over-allocate for tiny inputs
    grid = (pl.cdiv(M, bm),)           # edge block handled by Pallas; rows are
                                       # independent so OOB rows never leak in.

    scale2 = jnp.asarray(scale).reshape(1, d)
    args = [x2, scale2]
    in_specs = [
        pl.BlockSpec((bm, d), lambda i: (i, 0)),   # x rows, auto-pipelined
        pl.BlockSpec((1, d), lambda i: (0, 0)),    # scale, broadcast block
    ]
    has_offset = offset is not None
    if has_offset:
        args.append(jnp.asarray(offset).reshape(1, d))
        in_specs.append(pl.BlockSpec((1, d), lambda i: (0, 0)))

    kernel = functools.partial(
        _rmsnorm_kernel,
        eps=float(eps),
        inv_sqrt_dx=float(d_x) ** -0.5,
        partial_size=partial_size,
        has_offset=has_offset,
    )

    out = pl.pallas_call(
        kernel,
        out_shape=jax.ShapeDtypeStruct((M, d), x.dtype),
        grid=grid,
        in_specs=in_specs,
        out_specs=pl.BlockSpec((bm, d), lambda i: (i, 0)),
        compiler_params=pltpu.CompilerParams(
            dimension_semantics=("parallel",)),    # multi-TC chips split rows
    )(*args)

    return out.reshape(orig_shape)


def rmsnorm_ref(x, scale, offset=None, p=-1.0, eps=1e-8):
    # pure-JAX reference mirroring the torch module
    d = x.shape[-1]
    if 0.0 <= p <= 1.0:
        partial_size = int(d * p)
        norm_x = jnp.linalg.norm(x[..., :partial_size], axis=-1, keepdims=True)
        d_x = partial_size
    else:
        norm_x = jnp.linalg.norm(x, axis=-1, keepdims=True)
        d_x = d
    rms_x = norm_x * d_x ** (-0.5)
    x_normed = x / (rms_x + eps)
    out = scale * x_normed
    if offset is not None:
        out = out + offset
    return out


if __name__ == "__main__":
    B, S, D = 2, 8, 32
    key = jax.random.PRNGKey(0)
    kx, ks, ko = jax.random.split(key, 3)

    x = jax.random.normal(kx, (B, S, D), jnp.float32)
    scale = jax.random.uniform(ks, (D,), jnp.float32, 0.5, 1.5)
    offset = jax.random.uniform(ko, (D,), jnp.float32, -0.1, 0.1)

    # default: full RMSNorm, no bias
    out = rmsnorm(x, scale)
    out = jax.block_until_ready(out)
    ref = rmsnorm_ref(x, scale)
    assert out.shape == (B, S, D)
    assert out.dtype == x.dtype
    assert jnp.allclose(out, ref, atol=1e-5, rtol=1e-5), "mismatch (full RMSNorm)"

    # partial RMSNorm (p=0.5) with bias
    out_p = rmsnorm(x, scale, offset, p=0.5)
    out_p = jax.block_until_ready(out_p)
    ref_p = rmsnorm_ref(x, scale, offset, p=0.5)
    assert jnp.allclose(out_p, ref_p, atol=1e-5, rtol=1e-5), "mismatch (partial RMSNorm)"

    print("KERNEL_OK")
</pallas_src>

<mosaic_0001>
module attributes {stable_mosaic.version = 11 : i64} {
  func.func @_rmsnorm_kernel(%arg0: i32, %arg1: memref<16x32xf32, #tpu.memory_space<vmem>>, %arg2: memref<1x32xf32, #tpu.memory_space<vmem>>, %arg3: memref<16x32xf32, #tpu.memory_space<vmem>>) attributes {dimension_semantics = [#tpu.dimension_semantics<parallel>], iteration_bounds = array<i64: 1>, scalar_prefetch = 0 : i64, scratch_operands = 0 : i64, tpu.core_type = #tpu.core_type<tc>, window_params = [{transform_indices = @transform_0, window_bounds = array<i64: 16, 32>}, {pipeline_mode = #tpu.pipeline_mode<synchronous>, transform_indices = @transform_1, window_bounds = array<i64: 1, 32>}, {transform_indices = @transform_2, window_bounds = array<i64: 16, 32>}]} {
    %c0 = arith.constant 0 : index
    %c0_0 = arith.constant 0 : index
    %0 = vector.load %arg1[%c0, %c0_0] : memref<16x32xf32, #tpu.memory_space<vmem>>, vector<16x32xf32>
    %1 = arith.mulf %0, %0 : vector<16x32xf32>
    %cst = arith.constant dense<0.000000e+00> : vector<16xf32>
    %2 = vector.multi_reduction <add>, %1, %cst [1] : vector<16x32xf32> to vector<16xf32>
    %3 = vector.shape_cast %2 : vector<16xf32> to vector<16x1xf32>
    %4 = math.sqrt %3 : vector<16x1xf32>
    %cst_1 = arith.constant 0.176776692 : f32
    %5 = vector.broadcast %cst_1 : f32 to vector<16x1xf32>
    %6 = arith.mulf %4, %5 : vector<16x1xf32>
    %cst_2 = arith.constant 9.99999993E-9 : f32
    %7 = vector.broadcast %cst_2 : f32 to vector<16x1xf32>
    %8 = arith.addf %6, %7 : vector<16x1xf32>
    %9 = tpu.reciprocal %8 : vector<16x1xf32> -> vector<16x1xf32>
    %10 = vector.broadcast %9 : vector<16x1xf32> to vector<16x32xf32>
    %11 = arith.mulf %0, %10 : vector<16x32xf32>
    %c0_3 = arith.constant 0 : index
    %c0_4 = arith.constant 0 : index
    %12 = vector.load %arg2[%c0_3, %c0_4] : memref<1x32xf32, #tpu.memory_space<vmem>>, vector<1x32xf32>
    %13 = vector.broadcast %12 : vector<1x32xf32> to vector<16x32xf32>
    %14 = arith.mulf %11, %13 : vector<16x32xf32>
    %c0_5 = arith.constant 0 : index
    %c0_6 = arith.constant 0 : index
    %15 = vector.load %arg3[%c0_5, %c0_6] : memref<16x32xf32, #tpu.memory_space<vmem>>, vector<16x32xf32>
    tpu.vector_store %arg3[%c0_5, %c0_6], %14 {strides = array<i32>} : memref<16x32xf32, #tpu.memory_space<vmem>>, vector<16x32xf32>,
    return
  }
  func.func @transform_0(%arg0: i32) -> (i32, i32) {
    %c0_i32 = arith.constant 0 : i32
    %c0_i32_0 = arith.constant 0 : i32
    return %arg0, %c0_i32 : i32, i32
  }
  func.func @transform_1(%arg0: i32) -> (i32, i32) {
    %c0_i32 = arith.constant 0 : i32
    %c0_i32_0 = arith.constant 0 : i32
    %c0_i32_1 = arith.constant 0 : i32
    return %c0_i32, %c0_i32_0 : i32, i32
  }
  func.func @transform_2(%arg0: i32) -> (i32, i32) {
    %c0_i32 = arith.constant 0 : i32
    %c0_i32_0 = arith.constant 0 : i32
    return %arg0, %c0_i32 : i32, i32
  }
}

</mosaic_0001>

<bundles_post_ra>
// kernel: tpu_custom_call.1
= control target key start
LH: loop header
LB: loop body
LE: loop exit
PB: predicated region body
PF: predicated region fallthrough
CT: control target
= control target key end

     0   :  { %7 = vsyncpa [#allocation3], 0  ;;  %s204_s0 = inlined_call_operand.hbm [shape: f32[16,32], index: 0, kind: input, shape index: {}]   ;;  %s205_s1 = inlined_call_operand.vmem [shape: f32[1,32], index: 1, kind: input, shape index: {}]   ;;  %s206_s2 = inlined_call_operand.hbm [shape: f32[16,32], index: 2, kind: output, shape index: {}]  }
   0x1   :  { %8 = vsyncpa [#allocation4], 0  ;;  %s148_s9 = smov [#allocation2]   ;;  %s100_s13 = scalar_lea.hbm %s204_s0, 256 }
   0x2   :  { %s14_s10 = sshll.u32 %s148_s9, 4  ;;  %p101_p0 = scmp.ne.s32.totalorder %s204_s0, %s100_s13  ;;  %s15_s10 = int_to_ptr.vmem [resolvable:$true] %s14_s10 }
   0x3   :  { %p104_p1 = scmp.lt.u32.totalorder %s100_s13, %s204_s0 }
   0x5   :  { %p106_p2 = pnand %p104_p1, %p101_p0 }
   0x7   :  { %109 = shalt.err (!%p106_p2)
}
   0x8   :  { %s110_s18 = scalar_lea.vmem %s15_s10, 256  ;;  %p115_p4 = scmp.lt.s32.totalorder %s15_s10, %s15_s10 }
   0x9   :  { %p111_p3 = scmp.ne.s32.totalorder %s15_s10, %s110_s18  ;;  %p116_p5 = scmp.lt.s32.totalorder %s110_s18, %s110_s18 }
   0xb   :  { %p117_p6 = por %p116_p5, %p115_p4 }
   0xd   :  { %p118_p7 = pnand %p117_p6, %p111_p3 }
   0xf   :  { %121 = shalt.err (!%p118_p7)
}
  0x10   :  { %s149_s19 = smov 128   ;;  %s150_s20 = smov 8  }
  0x11   :  { %20 = dma.hbm_to_vmem [thread:$0]  %s204_s0, 256, %s15_s10, [#allocation3], %s149_s19, %s149_s19, %s150_s20  }
  0x12   :  { %144 = dma.done.wait [#allocation3], 256  }
  0x13   :  { %145 = vsyncadd [#allocation3], 4294967040  ;;  %v26_v0 = vld [vmem:[#allocation2] sm:$0xff]  ;;  %vm30_vm0 = vcmask 261120   ;;  %v27_v1 = vld [vmem:[#allocation2 + $0x8] sm:$0xff]  ;;  %s151_s24 = smov [#allocation5]  }
  0x14   :  { %v28_v2 = vmul.f32 %v26_v0, %v26_v0  ;;  %v29_v3 = vmul.f32 %v27_v1, %v27_v1  ;;  %v87_v23 = vld [vmem:[%s205_s1] ss:$0 sm:$0xff]  ;;  %s75_s25 = sshll.u32 %s151_s24, 4  ;;  %s76_s25 = int_to_ptr.vmem [resolvable:$true] %s75_s25 }
  0x15   :  { %s122_s26 = scalar_lea.vmem %s76_s25, 256  ;;  %p127_p9 = scmp.lt.s32.totalorder %s76_s25, %s76_s25 }
  0x16   :  { %v31_v4 = vsel %vm30_vm0, %v28_v2, 0.0  ;;  %v34_v5 = vsel %vm30_vm0, %v29_v3, 0.0  ;;  %p123_p8 = scmp.ne.s32.totalorder %s76_s25, %s122_s26  ;;  %p128_p10 = scmp.lt.s32.totalorder %s122_s26, %s122_s26 }
  0x17   :  { %32 = vadd.xlane.f32.xlu0 %v31_v4 }
  0x18   :  { %p129_p11 = por %p128_p10, %p127_p9 }
  0x1a   :  { %p130_p12 = pnand %p129_p11, %p123_p8 }
  0x1b   :  { %35 = vadd.xlane.f32.xlu0 %v34_v5 }
  0xa4   :  { %v33_v6 = vpop.xlane.xlu0 %32 }
  0xa5   :  { %92 = vrsqrt.f32 %v33_v6  ;;  %vm39_vm1 = vcmp.eq.f32.partialorder %v33_v6, inf  ;;  %v42_v10 = vand.u32 2147483648, %v33_v6  ;;  %vm41_vm2 = vcmp.eq.f32.partialorder %v33_v6, 0.0 }
  0xa8   :  { %v36_v7 = vpop.xlane.xlu0 %35 }
  0xa9   :  { %94 = vrsqrt.f32 %v36_v7  ;;  %vm46_vm3 = vcmp.eq.f32.partialorder %v36_v7, inf  ;;  %v49_v16 = vand.u32 2147483648, %v36_v7  ;;  %vm48_vm4 = vcmp.eq.f32.partialorder %v36_v7, 0.0 }
  0xaf   :  { %v93_v8 = vpop.eup %92 }
  0xb0   :  { %v38_v9 = vmul.f32 %v93_v8, %v33_v6 }
  0xb2   :  { %v40_v11 = vsel %vm39_vm1, %v33_v6, %v38_v9 }
  0xb3   :  { %v95_v12 = vpop.eup %94  ;;  %v43_v13 = vsel %vm41_vm2, %v42_v10, %v40_v11 }
  0xb4   :  { %v51_v14 = vmul.f32 0.17677669, %v43_v13  ;;  %v45_v15 = vmul.f32 %v95_v12, %v36_v7 }
  0xb6   :  { %v53_v17 = vadd.f32 1e-08, %v51_v14  ;;  %v47_v18 = vsel %vm46_vm3, %v36_v7, %v45_v15 }
  0xb7   :  { %v50_v19 = vsel %vm48_vm4, %v49_v16, %v47_v18 }
  0xb8   :  { %96 = vrcp.f32 %v53_v17  ;;  %v52_v20 = vmul.f32 0.17677669, %v50_v19 }
  0xba   :  { %v54_v21 = vadd.f32 1e-08, %v52_v20 }
  0xbc   :  { %98 = vrcp.f32 %v54_v21 }
  0xc2   :  { %v97_v22 = vpop.eup %96 }
  0xc3   :  { %v57_v24 = vmul.f32 %v97_v22, %v26_v0 }
  0xc5   :  { %v66_v25 = vmul.f32 %v87_v23, %v57_v24 }
  0xc6   :  { %v99_v26 = vpop.eup %98 }
  0xc7   :  { %v58_v27 = vmul.f32 %v99_v26, %v27_v1  ;;  %68 = vst.msk [vmem:[#allocation5] sm:$0xff] %vm30_vm0, %v66_v25 }
  0xc9   :  { %v67_v28 = vmul.f32 %v87_v23, %v58_v27 }
  0xcb   :  { %69 = vst.msk [vmem:[#allocation5 + $0x8] sm:$0xff] %vm30_vm0, %v67_v28 }
  0xcc   :  { %133 = shalt.err (!%p130_p12)
}
  0xcd   :  { %s134_s28 = scalar_lea.hbm %s206_s2, 256 }
  0xce   :  { %p135_p13 = scmp.ne.s32.totalorder %s206_s2, %s134_s28  ;;  %p138_p0 = scmp.lt.u32.totalorder %s134_s28, %s206_s2 }
  0xd0   :  { %p140_p1 = pnand %p138_p0, %p135_p13 }
  0xd2   :  { %143 = shalt.err (!%p140_p1)
}
  0xd3   :  { %81 = dma.vmem_to_hbm [thread:$0]  %s76_s25, 256, %s206_s2, [#allocation4], %s149_s19, %s149_s19, %s150_s20  }
  0xd4   :  { %146 = dma.done.wait [#allocation4], 256  }
  0xd5   :  { %147 = vsyncadd [#allocation4], 4294967040 }
  0xd6   :  { %85 = vsyncpa [#allocation3], 1 }
  0xd7   :  { %86 = vsyncpa [#allocation4], 1 }

</bundles_post_ra>
